<compile_context>
chip_gen: v5e
topology: v5e:2x2
jax: 0.10.0
libtpu: 0.0.40
codegen_flags: <defaults>
</compile_context>

<pallas_src>
import jax
import jax.numpy as jnp
from jax.experimental import pallas as pl
from jax.experimental.pallas import tpu as pltpu


def _ae_kernel(x_ref,
               w1_ref, b1_ref,   # encoder Linear1 (BN1 folded in), bf16 / f32
               w2_ref, b2_ref,   # encoder Linear2
               w3_ref, b3_ref,   # decoder Linear1 (BN2 folded in)
               w4_ref, b4_ref,   # decoder Linear2
               recon_ref, emb_ref):
    x = x_ref[...].astype(jnp.bfloat16)

    # ---- encoder ----
    h = jnp.dot(x, w1_ref[...], preferred_element_type=jnp.float32) + b1_ref[...]
    h = jnp.maximum(h, 0.0)                    # BN folded into w1/b1; ReLU (f32 on VPU)
    # Dropout (eval) == identity               # TODO(synk): train-mode stochastic dropout not reproduced
    emb = jnp.dot(h.astype(jnp.bfloat16), w2_ref[...],
                  preferred_element_type=jnp.float32) + b2_ref[...]
    emb = jnp.maximum(emb, 0.0)                # ReLU

    # ---- decoder ----
    g = jnp.dot(emb.astype(jnp.bfloat16), w3_ref[...],
                preferred_element_type=jnp.float32) + b3_ref[...]
    g = jnp.maximum(g, 0.0)                    # BN folded into w3/b3; ReLU
    recon = jnp.dot(g.astype(jnp.bfloat16), w4_ref[...],
                    preferred_element_type=jnp.float32) + b4_ref[...]

    recon_ref[...] = recon.astype(recon_ref.dtype)
    emb_ref[...] = emb.astype(emb_ref.dtype)


def _round_up(n, m):
    return ((n + m - 1) // m) * m


def _tensorcores_per_chip():
    # v7x has 2 TensorCores per chip; v5e/v6e have 1.  The ceil(B/2) tile cap only
    # helps when the "parallel" grid axis can actually shard across cores.
    try:
        kind = jax.devices()[0].device_kind.lower()
    except Exception:
        return 1
    return 2 if "v7" in kind else 1


def _max_tile_for_vmem(D, H, E, budget_bytes):
    # Per-row VMEM: double-buffered f32 x / recon / emb blocks + in-kernel f32
    # temps (h, emb, g, recon) + their transient bf16 casts.
    io_per_row = 2 * 4 * (2 * D + E)
    tmp_per_row = (4 + 2) * (2 * H + E + D)
    per_row = io_per_row + tmp_per_row
    # Weights (bf16) + biases (f32), conservatively counted double-buffered.
    weights = 2 * (2 * (D * H + H * E + E * H + H * D) + 4 * (2 * H + E + D))
    avail = max(budget_bytes - weights, per_row * 8)
    return max(8, (avail // per_row) // 8 * 8)


def fold_bn_params(params):
    """Fold eval-mode BatchNorm into the preceding Linear and cast weights to bf16.

    Call once (hoisted); the returned dict is what forest_autoencoder consumes.
    (x @ w + b) * s + t == x @ (w * s) + (b * s + t)
    """
    w1 = (params["w1"] * params["bn1_scale"]).astype(jnp.bfloat16)
    b1 = params["b1"] * params["bn1_scale"] + params["bn1_shift"]
    w3 = (params["w3"] * params["bn2_scale"]).astype(jnp.bfloat16)
    b3 = params["b3"] * params["bn2_scale"] + params["bn2_shift"]
    return dict(w1=w1, b1=b1.astype(jnp.float32),
                w2=params["w2"].astype(jnp.bfloat16), b2=params["b2"].astype(jnp.float32),
                w3=w3, b3=b3.astype(jnp.float32),
                w4=params["w4"].astype(jnp.bfloat16), b4=params["b4"].astype(jnp.float32))


def forest_autoencoder(x, folded, *, batch_tile=1024, vmem_budget_bytes=24 << 20):
    """x: (B, D) float32, folded: output of fold_bn_params.
    Returns (reconstruction (B, D) f32, embedding (B, E) f32)."""
    B, D = x.shape
    H = folded["w1"].shape[1]
    E = folded["w2"].shape[1]

    # ---- choose the batch tile ----
    # Single-TC chips (v5e/v6e): one big tile (fewest grid steps, best amortization
    # of the ~0.35 us/step overhead and the 4 weight loads).
    # 2-TC chips (v7x): cap at ceil(B/2) so both cores get work; large B still uses
    # many ~batch_tile-sized parallel steps.
    # Always bounded by an explicit VMEM budget (matters if D grows large).
    tile_vmem = _max_tile_for_vmem(D, H, E, vmem_budget_bytes)
    if _tensorcores_per_chip() >= 2:
        cap = _round_up(pl.cdiv(B, 2), 8)
    else:
        cap = _round_up(B, 8)
    tile = max(8, min(batch_tile, cap, tile_vmem))
    grid = (pl.cdiv(B, tile),)   # trailing partial block: reads padded, writes masked

    def rep2(shape):
        # weight / bias block: full array, replicated across the batch grid
        return pl.BlockSpec(shape, lambda i: (0, 0))

    in_specs = [
        pl.BlockSpec((tile, D), lambda i: (i, 0)),   # x tiled over batch
        rep2((D, H)), rep2((1, H)),                   # w1', b1'   (BN1 folded)
        rep2((H, E)), rep2((1, E)),                   # w2,  b2
        rep2((E, H)), rep2((1, H)),                   # w3', b3'   (BN2 folded)
        rep2((H, D)), rep2((1, D)),                   # w4,  b4
    ]
    out_specs = [
        pl.BlockSpec((tile, D), lambda i: (i, 0)),    # reconstruction
        pl.BlockSpec((tile, E), lambda i: (i, 0)),    # embedding
    ]

    weight_elems = D * H + H * E + E * H + H * D
    cost = pl.CostEstimate(
        flops=2 * B * weight_elems,
        transcendentals=0,
        bytes_accessed=4 * B * (2 * D + E) + 2 * weight_elems + 4 * (2 * H + E + D),
    )

    recon, emb = pl.pallas_call(
        _ae_kernel,
        out_shape=(jax.ShapeDtypeStruct((B, D), jnp.float32),
                   jax.ShapeDtypeStruct((B, E), jnp.float32)),
        grid_spec=pltpu.PrefetchScalarGridSpec(
            num_scalar_prefetch=0,
            grid=grid,
            in_specs=in_specs,
            out_specs=out_specs,
        ),
        compiler_params=pltpu.CompilerParams(
            dimension_semantics=("parallel",),
            vmem_limit_bytes=32 << 20,
        ),
        cost_estimate=cost,
    )(x, folded["w1"], folded["b1"], folded["w2"], folded["b2"],
      folded["w3"], folded["b3"], folded["w4"], folded["b4"])
    return recon, emb


def init_params(key, input_dim, embedding_dim=32, hidden=64, eps=1e-5):
    ks = jax.random.split(key, 12)

    def linear(kw, kb, fan_in, fan_out):
        # PyTorch nn.Linear default init: U(-1/sqrt(fan_in), 1/sqrt(fan_in))
        bound = 1.0 / jnp.sqrt(fan_in)
        w = jax.random.uniform(kw, (fan_in, fan_out), jnp.float32, -bound, bound)
        b = jax.random.uniform(kb, (1, fan_out), jnp.float32, -bound, bound)
        return w, b

    w1, b1 = linear(ks[0], ks[1], input_dim, hidden)
    w2, b2 = linear(ks[2], ks[3], hidden, embedding_dim)
    w3, b3 = linear(ks[4], ks[5], embedding_dim, hidden)
    w4, b4 = linear(ks[6], ks[7], hidden, input_dim)

    def bn_fold(kg, kb):
        # gamma/beta made non-trivial (deterministic) to exercise the affine;
        # running_mean=0, running_var=1 as at PyTorch init.
        gamma = 1.0 + 0.1 * jax.random.normal(kg, (1, hidden), jnp.float32)
        beta = 0.1 * jax.random.normal(kb, (1, hidden), jnp.float32)
        run_mean = jnp.zeros((1, hidden), jnp.float32)
        run_var = jnp.ones((1, hidden), jnp.float32)
        scale = gamma / jnp.sqrt(run_var + eps)
        shift = beta - run_mean * scale
        return scale, shift

    bn1_scale, bn1_shift = bn_fold(ks[8], ks[9])
    bn2_scale, bn2_shift = bn_fold(ks[10], ks[11])

    return dict(w1=w1, b1=b1, bn1_scale=bn1_scale, bn1_shift=bn1_shift,
                w2=w2, b2=b2,
                w3=w3, b3=b3, bn2_scale=bn2_scale, bn2_shift=bn2_shift,
                w4=w4, b4=b4)


def reference_forward(x, p):
    h = jnp.maximum((x @ p["w1"] + p["b1"]) * p["bn1_scale"] + p["bn1_shift"], 0.0)
    emb = jnp.maximum(h @ p["w2"] + p["b2"], 0.0)
    g = jnp.maximum((emb @ p["w3"] + p["b3"]) * p["bn2_scale"] + p["bn2_shift"], 0.0)
    recon = g @ p["w4"] + p["b4"]
    return recon, emb


if __name__ == "__main__":
    key = jax.random.PRNGKey(0)
    k_x, k_p, k_x2 = jax.random.split(key, 3)

    batch, input_dim, embedding_dim = 8, 16, 32
    x = jax.random.normal(k_x, (batch, input_dim), jnp.float32)
    params = init_params(k_p, input_dim, embedding_dim)
    folded = fold_bn_params(params)   # BN fold + bf16 cast hoisted out of the call

    recon, emb = forest_autoencoder(x, folded)
    recon, emb = jax.block_until_ready((recon, emb))

    ref_recon, ref_emb = reference_forward(x, params)
    assert recon.shape == (batch, input_dim)
    assert emb.shape == (batch, embedding_dim)
    # bf16 MXU operands (f32 accumulation) -> relaxed tolerance vs f32 reference.
    assert jnp.allclose(recon, ref_recon, atol=5e-2, rtol=5e-2)
    assert jnp.allclose(emb, ref_emb, atol=5e-2, rtol=5e-2)

    # Also exercise the partial trailing-block path (B not a multiple of 8).
    x2 = jax.random.normal(k_x2, (13, input_dim), jnp.float32)
    recon2, emb2 = jax.block_until_ready(forest_autoencoder(x2, folded))
    ref_recon2, ref_emb2 = reference_forward(x2, params)
    assert recon2.shape == (13, input_dim) and emb2.shape == (13, embedding_dim)
    assert jnp.allclose(recon2, ref_recon2, atol=5e-2, rtol=5e-2)
    assert jnp.allclose(emb2, ref_emb2, atol=5e-2, rtol=5e-2)

    print("KERNEL_OK")
</pallas_src>

<mosaic_0001>
module attributes {stable_mosaic.version = 11 : i64} {
  func.func @_ae_kernel(%arg0: i32, %arg1: memref<8x16xf32, #tpu.memory_space<vmem>>, %arg2: memref<16x64xbf16, #tpu.memory_space<vmem>>, %arg3: memref<1x64xf32, #tpu.memory_space<vmem>>, %arg4: memref<64x32xbf16, #tpu.memory_space<vmem>>, %arg5: memref<1x32xf32, #tpu.memory_space<vmem>>, %arg6: memref<32x64xbf16, #tpu.memory_space<vmem>>, %arg7: memref<1x64xf32, #tpu.memory_space<vmem>>, %arg8: memref<64x16xbf16, #tpu.memory_space<vmem>>, %arg9: memref<1x16xf32, #tpu.memory_space<vmem>>, %arg10: memref<8x16xf32, #tpu.memory_space<vmem>>, %arg11: memref<8x32xf32, #tpu.memory_space<vmem>>) attributes {dimension_semantics = [#tpu.dimension_semantics<parallel>], iteration_bounds = array<i64: 1>, scalar_prefetch = 0 : i64, scratch_operands = 0 : i64, tpu.core_type = #tpu.core_type<tc>, window_params = [{transform_indices = @transform_0, window_bounds = array<i64: 8, 16>}, {pipeline_mode = #tpu.pipeline_mode<synchronous>, transform_indices = @transform_1, window_bounds = array<i64: 16, 64>}, {pipeline_mode = #tpu.pipeline_mode<synchronous>, transform_indices = @transform_2, window_bounds = array<i64: 1, 64>}, {pipeline_mode = #tpu.pipeline_mode<synchronous>, transform_indices = @transform_3, window_bounds = array<i64: 64, 32>}, {pipeline_mode = #tpu.pipeline_mode<synchronous>, transform_indices = @transform_4, window_bounds = array<i64: 1, 32>}, {pipeline_mode = #tpu.pipeline_mode<synchronous>, transform_indices = @transform_5, window_bounds = array<i64: 32, 64>}, {pipeline_mode = #tpu.pipeline_mode<synchronous>, transform_indices = @transform_6, window_bounds = array<i64: 1, 64>}, {pipeline_mode = #tpu.pipeline_mode<synchronous>, transform_indices = @transform_7, window_bounds = array<i64: 64, 16>}, {pipeline_mode = #tpu.pipeline_mode<synchronous>, transform_indices = @transform_8, window_bounds = array<i64: 1, 16>}, {transform_indices = @transform_9, window_bounds = array<i64: 8, 16>}, {transform_indices = @transform_10, window_bounds = array<i64: 8, 32>}]} {
    %c0 = arith.constant 0 : index
    %c0_0 = arith.constant 0 : index
    %0 = vector.load %arg1[%c0, %c0_0] : memref<8x16xf32, #tpu.memory_space<vmem>>, vector<8x16xf32>
    %1 = arith.truncf %0 : vector<8x16xf32> to vector<8x16xbf16>
    %c0_1 = arith.constant 0 : index
    %c0_2 = arith.constant 0 : index
    %2 = vector.load %arg2[%c0_1, %c0_2] : memref<16x64xbf16, #tpu.memory_space<vmem>>, vector<16x64xbf16>
    %cst = arith.constant dense<0.000000e+00> : vector<8x64xf32>
    %3 = tpu.matmul %1, %2, %cst {dimension_numbers = #tpu.dot_dimension_numbers<[1], [0], [0], [1], [0, 0, 1, 1], [], []>} : vector<8x16xbf16>, vector<16x64xbf16>, vector<8x64xf32> -> vector<8x64xf32>
    %c0_3 = arith.constant 0 : index
    %c0_4 = arith.constant 0 : index
    %4 = vector.load %arg3[%c0_3, %c0_4] : memref<1x64xf32, #tpu.memory_space<vmem>>, vector<1x64xf32>
    %5 = vector.broadcast %4 : vector<1x64xf32> to vector<8x64xf32>
    %6 = arith.addf %3, %5 : vector<8x64xf32>
    %cst_5 = arith.constant 0.000000e+00 : f32
    %7 = vector.broadcast %cst_5 : f32 to vector<8x64xf32>
    %8 = arith.maximumf %6, %7 : vector<8x64xf32>
    %9 = arith.truncf %8 : vector<8x64xf32> to vector<8x64xbf16>
    %c0_6 = arith.constant 0 : index
    %c0_7 = arith.constant 0 : index
    %10 = vector.load %arg4[%c0_6, %c0_7] : memref<64x32xbf16, #tpu.memory_space<vmem>>, vector<64x32xbf16>
    %cst_8 = arith.constant dense<0.000000e+00> : vector<8x32xf32>
    %11 = tpu.matmul %9, %10, %cst_8 {dimension_numbers = #tpu.dot_dimension_numbers<[1], [0], [0], [1], [0, 0, 1, 1], [], []>} : vector<8x64xbf16>, vector<64x32xbf16>, vector<8x32xf32> -> vector<8x32xf32>
    %c0_9 = arith.constant 0 : index
    %c0_10 = arith.constant 0 : index
    %12 = vector.load %arg5[%c0_9, %c0_10] : memref<1x32xf32, #tpu.memory_space<vmem>>, vector<1x32xf32>
    %13 = vector.broadcast %12 : vector<1x32xf32> to vector<8x32xf32>
    %14 = arith.addf %11, %13 : vector<8x32xf32>
    %cst_11 = arith.constant 0.000000e+00 : f32
    %15 = vector.broadcast %cst_11 : f32 to vector<8x32xf32>
    %16 = arith.maximumf %14, %15 : vector<8x32xf32>
    %17 = arith.truncf %16 : vector<8x32xf32> to vector<8x32xbf16>
    %c0_12 = arith.constant 0 : index
    %c0_13 = arith.constant 0 : index
    %18 = vector.load %arg6[%c0_12, %c0_13] : memref<32x64xbf16, #tpu.memory_space<vmem>>, vector<32x64xbf16>
    %cst_14 = arith.constant dense<0.000000e+00> : vector<8x64xf32>
    %19 = tpu.matmul %17, %18, %cst_14 {dimension_numbers = #tpu.dot_dimension_numbers<[1], [0], [0], [1], [0, 0, 1, 1], [], []>} : vector<8x32xbf16>, vector<32x64xbf16>, vector<8x64xf32> -> vector<8x64xf32>
    %c0_15 = arith.constant 0 : index
    %c0_16 = arith.constant 0 : index
    %20 = vector.load %arg7[%c0_15, %c0_16] : memref<1x64xf32, #tpu.memory_space<vmem>>, vector<1x64xf32>
    %21 = vector.broadcast %20 : vector<1x64xf32> to vector<8x64xf32>
    %22 = arith.addf %19, %21 : vector<8x64xf32>
    %cst_17 = arith.constant 0.000000e+00 : f32
    %23 = vector.broadcast %cst_17 : f32 to vector<8x64xf32>
    %24 = arith.maximumf %22, %23 : vector<8x64xf32>
    %25 = arith.truncf %24 : vector<8x64xf32> to vector<8x64xbf16>
    %c0_18 = arith.constant 0 : index
    %c0_19 = arith.constant 0 : index
    %26 = vector.load %arg8[%c0_18, %c0_19] : memref<64x16xbf16, #tpu.memory_space<vmem>>, vector<64x16xbf16>
    %cst_20 = arith.constant dense<0.000000e+00> : vector<8x16xf32>
    %27 = tpu.matmul %25, %26, %cst_20 {dimension_numbers = #tpu.dot_dimension_numbers<[1], [0], [0], [1], [0, 0, 1, 1], [], []>} : vector<8x64xbf16>, vector<64x16xbf16>, vector<8x16xf32> -> vector<8x16xf32>
    %c0_21 = arith.constant 0 : index
    %c0_22 = arith.constant 0 : index
    %28 = vector.load %arg9[%c0_21, %c0_22] : memref<1x16xf32, #tpu.memory_space<vmem>>, vector<1x16xf32>
    %29 = vector.broadcast %28 : vector<1x16xf32> to vector<8x16xf32>
    %30 = arith.addf %27, %29 : vector<8x16xf32>
    %c0_23 = arith.constant 0 : index
    %c0_24 = arith.constant 0 : index
    %31 = vector.load %arg10[%c0_23, %c0_24] : memref<8x16xf32, #tpu.memory_space<vmem>>, vector<8x16xf32>
    tpu.vector_store %arg10[%c0_23, %c0_24], %30 {strides = array<i32>} : memref<8x16xf32, #tpu.memory_space<vmem>>, vector<8x16xf32>,
    %c0_25 = arith.constant 0 : index
    %c0_26 = arith.constant 0 : index
    %32 = vector.load %arg11[%c0_25, %c0_26] : memref<8x32xf32, #tpu.memory_space<vmem>>, vector<8x32xf32>
    tpu.vector_store %arg11[%c0_25, %c0_26], %16 {strides = array<i32>} : memref<8x32xf32, #tpu.memory_space<vmem>>, vector<8x32xf32>,
    return
  }
  func.func @transform_0(%arg0: i32) -> (i32, i32) {
    %c0_i32 = arith.constant 0 : i32
    %c0_i32_0 = arith.constant 0 : i32
    return %arg0, %c0_i32 : i32, i32
  }
  func.func @transform_1(%arg0: i32) -> (i32, i32) {
    %c0_i32 = arith.constant 0 : i32
    %c0_i32_0 = arith.constant 0 : i32
    %c0_i32_1 = arith.constant 0 : i32
    return %c0_i32, %c0_i32_0 : i32, i32
  }
  func.func @transform_2(%arg0: i32) -> (i32, i32) {
    %c0_i32 = arith.constant 0 : i32
    %c0_i32_0 = arith.constant 0 : i32
    %c0_i32_1 = arith.constant 0 : i32
    return %c0_i32, %c0_i32_0 : i32, i32
  }
  func.func @transform_3(%arg0: i32) -> (i32, i32) {
    %c0_i32 = arith.constant 0 : i32
    %c0_i32_0 = arith.constant 0 : i32
    %c0_i32_1 = arith.constant 0 : i32
    return %c0_i32, %c0_i32_0 : i32, i32
  }
  func.func @transform_4(%arg0: i32) -> (i32, i32) {
    %c0_i32 = arith.constant 0 : i32
    %c0_i32_0 = arith.constant 0 : i32
    %c0_i32_1 = arith.constant 0 : i32
    return %c0_i32, %c0_i32_0 : i32, i32
  }
  func.func @transform_5(%arg0: i32) -> (i32, i32) {
    %c0_i32 = arith.constant 0 : i32
    %c0_i32_0 = arith.constant 0 : i32
    %c0_i32_1 = arith.constant 0 : i32
    return %c0_i32, %c0_i32_0 : i32, i32
  }
  func.func @transform_6(%arg0: i32) -> (i32, i32) {
    %c0_i32 = arith.constant 0 : i32
    %c0_i32_0 = arith.constant 0 : i32
    %c0_i32_1 = arith.constant 0 : i32
    return %c0_i32, %c0_i32_0 : i32, i32
  }
  func.func @transform_7(%arg0: i32) -> (i32, i32) {
    %c0_i32 = arith.constant 0 : i32
    %c0_i32_0 = arith.constant 0 : i32
    %c0_i32_1 = arith.constant 0 : i32
    return %c0_i32, %c0_i32_0 : i32, i32
  }
  func.func @transform_8(%arg0: i32) -> (i32, i32) {
    %c0_i32 = arith.constant 0 : i32
    %c0_i32_0 = arith.constant 0 : i32
    %c0_i32_1 = arith.constant 0 : i32
    return %c0_i32, %c0_i32_0 : i32, i32
  }
  func.func @transform_9(%arg0: i32) -> (i32, i32) {
    %c0_i32 = arith.constant 0 : i32
    %c0_i32_0 = arith.constant 0 : i32
    return %arg0, %c0_i32 : i32, i32
  }
  func.func @transform_10(%arg0: i32) -> (i32, i32) {
    %c0_i32 = arith.constant 0 : i32
    %c0_i32_0 = arith.constant 0 : i32
    return %arg0, %c0_i32 : i32, i32
  }
}

</mosaic_0001>

<bundles_post_ra>
// kernel: tpu_custom_call.1
= control target key start
LH: loop header
LB: loop body
LE: loop exit
PB: predicated region body
PF: predicated region fallthrough
CT: control target
= control target key end

     0   :  { %16 = vsyncpa [#allocation3], 0  ;;  %vm51_vm0 = vcmask 130048   ;;  %s482_s0 = inlined_call_operand.vmem [shape: f32[8,16], index: 0, kind: input, shape index: {}]   ;;  %s483_s1 = inlined_call_operand.vmem [shape: bf16[16,64], index: 1, kind: input, shape index: {}]   ;;  %s484_s2 = inlined_call_operand.vmem [shape: f32[1,64], index: 2, kind: input, shape index: {}]   ;;  %s485_s3 = inlined_call_operand.vmem [shape: bf16[64,32], index: 3, kind: input, shape index: {}]   ;;  %s486_s4 = inlined_call_operand.vmem [shape: f32[1,32], index: 4, kind: input, shape index: {}]   ;;  %s487_s5 = inlined_call_operand.vmem [shape: bf16[32,64], index: 5, kind: input, shape index: {}]   ;;  %s488_s6 = inlined_call_operand.vmem [shape: f32[1,64], index: 6, kind: input, shape index: {}]   ;;  %s489_s7 = inlined_call_operand.vmem [shape: bf16[64,16], index: 7, kind: input, shape index: {}]   ;;  %s490_s8 = inlined_call_operand.vmem [shape: f32[1,16], index: 8, kind: input, shape index: {}]   ;;  %s491_s9 = inlined_call_operand.hbm [shape: f32[8,16], index: 9, kind: output, shape index: {0}]   ;;  %s492_s10 = inlined_call_operand.hbm [shape: f32[8,32], index: 10, kind: output, shape index: {1}]  }
   0x1   :  { %v298_v0 = vld [vmem:[%s483_s1] sm:$0xff]  ;;  %v302_v2 = vld [vmem:[%s485_s3 + $0x18] sm:$0xff]  ;;  %v301_v4 = vld [vmem:[%s485_s3 + $0x10] sm:$0xff] }
   0x2   :  { %v37_v1 = vld [vmem:[%s482_s0] sm:$0xff]  ;;  %62 = vmatpush.bf16.msra.mxu0 %v298_v0  ;;  %114 = vmatpush.bf16.msra.mxu1 %v302_v2 }
   0x3   :  { %v38_v3 = vpack.c.bf16 %v37_v1, %v37_v1 }
   0x4   :  { %17 = vsyncpa [#allocation5], 0  ;;  %v300_v5 = vld [vmem:[%s485_s3 + $0x8] sm:$0xff]  ;;  %v299_v6 = vld [vmem:[%s485_s3] sm:$0xff]  ;;  %vm106_vm1 = vcmask 523264   ;;  %vm145_vm2 = vcmask 261120  }
   0x5   :  { %254 = vmatmul.msk.bf16.vlgmr.msra.gmra.mxu0 %vm51_vm0, %v38_v3  ;;  %v311_v7 = vld [vmem:[%s484_s2] ss:$0 sm:$0xff]  ;;  %v304_v13 = vld [vmem:[%s487_s5 + $0x8] sm:$0xff]  ;;  %v308_v15 = vld [vmem:[%s489_s7 + $0x18] sm:$0xff]  ;;  %s367_s17 = smov [#allocation4]   ;;  %s236_s1 = sshll.u32 %s492_s10, 4  ;;  %s237_s1 = int_to_ptr.hbm [resolvable:$true] %s236_s1 }
   0x6   :  { %115 = vmatpush.bf16.msra.mxu1 %v301_v4  ;;  %155 = vmatpush.bf16.msra.mxu2 %v304_v13  ;;  %v303_v14 = vld [vmem:[%s487_s5] sm:$0xff]  ;;  %v307_v16 = vld [vmem:[%s489_s7 + $0x10] sm:$0xff]  ;;  %v306_v23 = vld [vmem:[%s489_s7 + $0x8] sm:$0xff]  ;;  %s234_s18 = sshll.u32 %s367_s17, 4  ;;  %s225_s24 = sshll.u32 %s491_s9, 4  ;;  %s235_s18 = int_to_ptr.vmem [resolvable:$true] %s234_s18  ;;  %s226_s24 = int_to_ptr.hbm [resolvable:$true] %s225_s24 }
   0x7   :  { %207 = vmatpush.bf16.msra.mxu3 %v308_v15  ;;  %v312_v17 = vld [vmem:[%s486_s4] ss:$0 sm:$0xff] }
   0x8   :  { %v305_v24 = vld [vmem:[%s489_s7] sm:$0xff] }
   0x9   :  { %v313_v25 = vld [vmem:[%s488_s6] ss:$0 sm:$0xff]  ;;  %s368_s6 = smov [#allocation2]  }
   0xa   :  { %116 = vmatpush.bf16.msra.mxu1 %v300_v5  ;;  %156 = vmatpush.bf16.msra.mxu2 %v303_v14  ;;  %v314_v31 = vld [vmem:[%s490_s8] ss:$0 sm:$0xff]  ;;  %s223_s0 = sshll.u32 %s368_s6, 4  ;;  %s224_s0 = int_to_ptr.vmem [resolvable:$true] %s223_s0 }
   0xb   :  { %208 = vmatpush.bf16.msra.mxu3 %v307_v16 }
   0xe   :  { %117 = vmatpush.bf16.msra.mxu1 %v299_v6 }
   0xf   :  { %209 = vmatpush.bf16.msra.mxu3 %v306_v23 }
  0x13   :  { %210 = vmatpush.bf16.msra.mxu3 %v305_v24 }
  0x82   :  { %v64_v8 = vpop.f32.mrf.mxu0 }
  0x83   :  { %v65_v9 = vadd.f32 %v311_v7, %v64_v8 }
  0x85   :  { %v68_v10 = vmax.f32 %v65_v9, 0.0 }
  0x87   :  { %v69_v11 = vpack.c.bf16 %v68_v10, %v68_v10 }
  0x89   :  { %271 = vmatmul.msk.bf16.vlgmr.msra.gmra.mxu1 %vm106_vm1, %v69_v11 }
  0x8a   :  { %v66_v12 = vpop.f32.mrf.mxu0 }
 0x106   :  { %v119_v18 = vpop.f32.mrf.mxu1 }
 0x107   :  { %v120_v19 = vadd.f32 %v312_v17, %v119_v18 }
 0x109   :  { %v123_v20 = vmax.f32 %v120_v19, 0.0 }
 0x10b   :  { %v124_v21 = vpack.c.bf16 %v123_v20, %v123_v20  ;;  %217 = vst.msk [vmem:[#allocation4] sm:$0xff] %vm145_vm2, %v123_v20 }
 0x10c   :  { %239 = dma.vmem_to_hbm [thread:$0]  %s235_s18, 128, %s237_s1, [#allocation5]  }
 0x10d   :  { %280 = vmatmul.msk.bf16.vlgmr.msra.gmra.mxu2 %vm145_vm2, %v124_v21 }
 0x10e   :  { %v121_v22 = vpop.f32.mrf.mxu1 }
 0x190   :  { %v158_v26 = vpop.f32.mrf.mxu2 }
 0x191   :  { %v159_v27 = vadd.f32 %v313_v25, %v158_v26 }
 0x193   :  { %v162_v28 = vmax.f32 %v159_v27, 0.0 }
 0x195   :  { %v163_v29 = vpack.c.bf16 %v162_v28, %v162_v28 }
 0x197   :  { %297 = vmatmul.msk.bf16.vlgmr.msra.gmra.mxu3 %vm106_vm1, %v163_v29 }
 0x198   :  { %v160_v30 = vpop.f32.mrf.mxu2 }
 0x21a   :  { %v212_v32 = vpop.f32.mrf.mxu3 }
 0x21b   :  { %v213_v33 = vadd.f32 %v314_v31, %v212_v32 }
 0x21d   :  { %216 = vst.msk [vmem:[#allocation2] sm:$0xff] %vm51_vm0, %v213_v33 }
 0x21e   :  { %228 = dma.vmem_to_hbm [thread:$0]  %s224_s0, 128, %s226_s24, [#allocation3]  }
 0x222   :  { %v214_v34 = vpop.f32.mrf.mxu3 }
 0x223   :  { %363 = dma.done.wait [#allocation3], 128  }
 0x224   :  { %364 = vsyncadd [#allocation3], 4294967168 }
 0x225   :  { %365 = dma.done.wait [#allocation5], 128  }
 0x226   :  { %366 = vsyncadd [#allocation5], 4294967168 }
 0x227   :  { %248 = vsyncpa [#allocation3], 1 }
 0x228   :  { %249 = vsyncpa [#allocation5], 1 }

</bundles_post_ra>
